<compile_context>
chip_gen: v7x
topology: tpu7x:2x2x1
jax: 0.10.0
libtpu: 0.0.40
codegen_flags: <defaults>
</compile_context>

<pallas_src>
import math

import jax
import jax.numpy as jnp
from jax.experimental import pallas as pl
from jax.experimental.pallas import tpu as pltpu

_MiB = 1024 * 1024


def _round_up(x, m):
    return ((x + m - 1) // m) * m


def _vmem_capacity_bytes():
    """Physical VMEM per TensorCore (128 MiB on v5e/v6e, 64 MiB on v7x)."""
    try:
        info = pltpu.get_tpu_info()
        cap = getattr(info, "vmem_capacity_bytes", None)
        if cap:
            return int(cap)
    except Exception:
        pass
    return 128 * _MiB


# ----------------------------------------------------------------------------
# VMEM footprint models (worst case: every BlockSpec operand double-buffered).
# ----------------------------------------------------------------------------
def _resident_vmem_bytes(tm, d_model_p, d_ff_p, bpe):
    w_bytes = 2 * (2 * d_model_p * d_ff_p + d_ff_p + d_model_p) * bpe  # W1,W2,b1,b2
    io_bytes = 2 * 2 * tm * d_model_p * bpe                            # x + out tiles
    f32_tmp = (tm * d_ff_p + tm * d_model_p) * 4                       # h and y in f32
    return w_bytes + io_bytes + f32_tmp


def _streamed_vmem_bytes(tm, tk, d_model_p, bpe):
    slab_bytes = 2 * (2 * d_model_p * tk + tk + d_model_p) * bpe       # W1/W2/b1 slabs + b2
    io_bytes = 2 * 2 * tm * d_model_p * bpe                            # x + out tiles
    acc_bytes = tm * d_model_p * 4                                     # f32 accumulator
    f32_tmp = tm * tk * 4                                              # h tile in f32
    return slab_bytes + io_bytes + acc_bytes + f32_tmp


def _plan_tiles(M, d_model_p, d_ff_p, bpe, budget, force_path):
    """Pick (path, tm, tk) under the per-generation VMEM budget."""
    M8 = _round_up(M, 8)
    cands = [t for t in (2048, 1024, 768, 512, 384, 256, 128, 64, 32, 16, 8)
             if t <= M8] or [8]
    # Prefer >=2 row tiles so the "parallel" axis feeds both TensorCores (v7x).
    pref = [t for t in cands if -(-M8 // t) >= 2] or cands
    order = pref + [t for t in cands if t not in pref]

    # --- weights-resident fast path ------------------------------------------
    if force_path != "streamed":
        for tm in order:
            if _resident_vmem_bytes(tm, d_model_p, d_ff_p, bpe) <= budget:
                return "resident", tm, None
        if force_path == "resident":
            raise ValueError("weights do not fit the VMEM budget for the resident path")

    # --- streamed path: largest tm first (amortizes weight re-reads), then
    #     largest tk (fewer accumulator RMW sweeps / vst pressure on v5e). ----
    tks = [t for t in (1024, 512, 256, 128) if t <= d_ff_p]
    for tm in order:
        for tk in tks:
            if _streamed_vmem_bytes(tm, tk, d_model_p, bpe) <= budget:
                return "streamed", tm, tk
    return "streamed", cands[-1], 128  # last-resort minimal tiles


# ----------------------------------------------------------------------------
# Kernels
# ----------------------------------------------------------------------------
def _ffn_resident_kernel(x_ref, w1_ref, b1_ref, w2_ref, b2_ref, o_ref):
    # Weights have constant index_maps -> DMAed once, VMEM-resident.
    h = jnp.dot(x_ref[...], w1_ref[...], preferred_element_type=jnp.float32)
    h = jnp.maximum(h + b1_ref[...], 0.0)
    # dropout: identity (eval mode).
    y = jnp.dot(h.astype(w2_ref.dtype), w2_ref[...],
                preferred_element_type=jnp.float32)
    o_ref[...] = (y + b2_ref[...]).astype(o_ref.dtype)


def _ffn_streamed_kernel(x_ref, w1_ref, b1_ref, w2_ref, b2_ref, o_ref, acc_ref):
    # x_ref: (tm, d_model)   w1_ref: (d_model, tk)   b1_ref: (1, tk)
    # w2_ref: (tk, d_model)  b2_ref: (1, d_model)    o_ref/acc_ref: (tm, d_model)
    k = pl.program_id(1)

    @pl.when(k == 0)
    def _():
        acc_ref[...] = jnp.zeros_like(acc_ref)

    h = jnp.dot(x_ref[...], w1_ref[...], preferred_element_type=jnp.float32)
    h = jnp.maximum(h + b1_ref[...], 0.0)
    # dropout: identity (eval mode).
    acc_ref[...] += jnp.dot(h.astype(w2_ref.dtype), w2_ref[...],
                            preferred_element_type=jnp.float32)

    @pl.when(k == pl.num_programs(1) - 1)
    def _():
        o_ref[...] = (acc_ref[...] + b2_ref[...]).astype(o_ref.dtype)


# ----------------------------------------------------------------------------
# Wrapper
# ----------------------------------------------------------------------------
def feed_forward(x, w1, b1, w2, b2, *, compute_dtype=None, force_path=None,
                 vmem_limit_bytes=None):
    """x: (batch, seq, d_model) -> (batch, seq, d_model).

    compute_dtype: optional (e.g. jnp.bfloat16) matmul operand dtype; f32
        accumulation is kept and the output is cast back to x.dtype.
    force_path: None | "resident" | "streamed" (mainly for testing).
    """
    batch, seq, d_model = x.shape
    d_ff = w1.shape[1]
    M = batch * seq
    out_dtype = x.dtype

    if compute_dtype is not None:
        x = x.astype(compute_dtype)
        w1 = w1.astype(compute_dtype)
        b1 = b1.astype(compute_dtype)
        w2 = w2.astype(compute_dtype)
        b2 = b2.astype(compute_dtype)

    b1 = b1.reshape(1, d_ff)
    b2 = b2.reshape(1, d_model)
    bpe = jnp.dtype(x.dtype).itemsize

    # --- VMEM budget (generation-aware) --------------------------------------
    vmem_cap = _vmem_capacity_bytes()
    if vmem_limit_bytes is None:
        # ~100 MiB on 128-MiB parts (v5e/v6e), ~48 MiB on 64-MiB parts (v7x).
        vmem_limit_bytes = max(32 * _MiB, min(vmem_cap - 16 * _MiB, 100 * _MiB))
    budget = vmem_limit_bytes - 4 * _MiB  # headroom for compiler-internal scratch

    # --- tile plan ------------------------------------------------------------
    d_model_p = _round_up(d_model, 128)  # lane-dense last dims
    d_ff_p = _round_up(d_ff, 128)
    path, tm, tk = _plan_tiles(M, d_model_p, d_ff_p, bpe, budget, force_path)
    M_p = _round_up(M, tm)
    if path == "streamed":
        d_ff_p = _round_up(d_ff_p, tk)  # tk | d_ff_p

    # --- pad operands only when needed (zero padding keeps the math exact) ---
    x2d = x.reshape(M, d_model)
    if (M_p, d_model_p) != (M, d_model):
        x2d = jnp.pad(x2d, ((0, M_p - M), (0, d_model_p - d_model)))
    w1_p = w1 if (d_model_p, d_ff_p) == (d_model, d_ff) else jnp.pad(
        w1, ((0, d_model_p - d_model), (0, d_ff_p - d_ff)))
    b1_p = b1 if d_ff_p == d_ff else jnp.pad(b1, ((0, 0), (0, d_ff_p - d_ff)))
    w2_p = w2 if (d_ff_p, d_model_p) == (d_ff, d_model) else jnp.pad(
        w2, ((0, d_ff_p - d_ff), (0, d_model_p - d_model)))
    b2_p = b2 if d_model_p == d_model else jnp.pad(
        b2, ((0, 0), (0, d_model_p - d_model)))

    n_row_tiles = M_p // tm
    w_reads = 1 if path == "resident" else n_row_tiles  # weight re-streaming
    cost = pl.CostEstimate(
        flops=4 * M * d_model * d_ff,  # two matmuls
        transcendentals=0,
        bytes_accessed=((x2d.size + M_p * d_model_p) * bpe
                        + (w1_p.size + w2_p.size + b1_p.size) * bpe * w_reads
                        + b2_p.size * bpe),
    )

    if path == "resident":
        out2d = pl.pallas_call(
            _ffn_resident_kernel,
            out_shape=jax.ShapeDtypeStruct((M_p, d_model_p), out_dtype),
            grid=(n_row_tiles,),
            in_specs=[
                pl.BlockSpec((tm, d_model_p), lambda i: (i, 0)),       # x rows
                pl.BlockSpec((d_model_p, d_ff_p), lambda i: (0, 0)),   # W1 (resident)
                pl.BlockSpec((1, d_ff_p), lambda i: (0, 0)),           # b1 (resident)
                pl.BlockSpec((d_ff_p, d_model_p), lambda i: (0, 0)),   # W2 (resident)
                pl.BlockSpec((1, d_model_p), lambda i: (0, 0)),        # b2 (resident)
            ],
            out_specs=pl.BlockSpec((tm, d_model_p), lambda i: (i, 0)),
            compiler_params=pltpu.CompilerParams(
                dimension_semantics=("parallel",),
                vmem_limit_bytes=vmem_limit_bytes,
            ),
            cost_estimate=cost,
        )(x2d, w1_p, b1_p, w2_p, b2_p)
    else:
        out2d = pl.pallas_call(
            _ffn_streamed_kernel,
            out_shape=jax.ShapeDtypeStruct((M_p, d_model_p), out_dtype),
            grid=(n_row_tiles, d_ff_p // tk),
            in_specs=[
                pl.BlockSpec((tm, d_model_p), lambda i, k: (i, 0)),    # x rows
                pl.BlockSpec((d_model_p, tk), lambda i, k: (0, k)),    # W1 k-slab
                pl.BlockSpec((1, tk), lambda i, k: (0, k)),            # b1 k-slab
                pl.BlockSpec((tk, d_model_p), lambda i, k: (k, 0)),    # W2 k-slab
                pl.BlockSpec((1, d_model_p), lambda i, k: (0, 0)),     # b2
            ],
            out_specs=pl.BlockSpec((tm, d_model_p), lambda i, k: (i, 0)),
            scratch_shapes=[pltpu.VMEM((tm, d_model_p), jnp.float32)],
            compiler_params=pltpu.CompilerParams(
                dimension_semantics=("parallel", "arbitrary"),
                vmem_limit_bytes=vmem_limit_bytes,
            ),
            cost_estimate=cost,
        )(x2d, w1_p, b1_p, w2_p, b2_p)

    if (M_p, d_model_p) != (M, d_model):
        out2d = out2d[:M, :d_model]
    return out2d.reshape(batch, seq, d_model)


def init_params(key, d_model, d_ff, dtype=jnp.float32):
    """Deterministic init mimicking nn.Linear's U(-1/sqrt(fan_in), 1/sqrt(fan_in))."""
    k1, k2, k3, k4 = jax.random.split(key, 4)
    bound1 = 1.0 / math.sqrt(d_model)
    bound2 = 1.0 / math.sqrt(d_ff)
    # stored transposed vs. PyTorch: (in, out)
    w1 = jax.random.uniform(k1, (d_model, d_ff), dtype, -bound1, bound1)
    b1 = jax.random.uniform(k2, (1, d_ff), dtype, -bound1, bound1)
    w2 = jax.random.uniform(k3, (d_ff, d_model), dtype, -bound2, bound2)
    b2 = jax.random.uniform(k4, (1, d_model), dtype, -bound2, bound2)
    return w1, b1, w2, b2


if __name__ == "__main__":
    key = jax.random.PRNGKey(0)
    kx, kp = jax.random.split(key)

    batch, seq, d_model, d_ff = 2, 8, 32, 64
    x = jax.random.normal(kx, (batch, seq, d_model), jnp.float32)
    w1, b1, w2, b2 = init_params(kp, d_model, d_ff)

    # pure-JAX reference (dropout = identity, eval mode)
    ref = jnp.maximum(x @ w1 + b1[0], 0.0) @ w2 + b2[0]

    # Weights-resident fast path (auto-selected for small models).
    out_res = jax.block_until_ready(feed_forward(x, w1, b1, w2, b2))
    # d_ff-streamed path (used when the weights overflow the VMEM budget).
    out_str = jax.block_until_ready(
        feed_forward(x, w1, b1, w2, b2, force_path="streamed"))

    for out in (out_res, out_str):
        assert out.shape == (batch, seq, d_model)
        assert jnp.allclose(out, ref, atol=1e-5, rtol=1e-5)

    print("KERNEL_OK")
</pallas_src>

<mosaic_0001>
module attributes {stable_mosaic.version = 11 : i64} {
  func.func @_ffn_resident_kernel(%arg0: i32, %arg1: memref<8x128xf32, #tpu.memory_space<vmem>>, %arg2: memref<128x128xf32, #tpu.memory_space<vmem>>, %arg3: memref<1x128xf32, #tpu.memory_space<vmem>>, %arg4: memref<128x128xf32, #tpu.memory_space<vmem>>, %arg5: memref<1x128xf32, #tpu.memory_space<vmem>>, %arg6: memref<8x128xf32, #tpu.memory_space<vmem>>) attributes {dimension_semantics = [#tpu.dimension_semantics<parallel>], iteration_bounds = array<i64: 2>, scalar_prefetch = 0 : i64, scratch_operands = 0 : i64, tpu.core_type = #tpu.core_type<tc>, window_params = [{transform_indices = @transform_0, window_bounds = array<i64: 8, 128>}, {pipeline_mode = #tpu.pipeline_mode<synchronous>, transform_indices = @transform_1, window_bounds = array<i64: 128, 128>}, {pipeline_mode = #tpu.pipeline_mode<synchronous>, transform_indices = @transform_2, window_bounds = array<i64: 1, 128>}, {pipeline_mode = #tpu.pipeline_mode<synchronous>, transform_indices = @transform_3, window_bounds = array<i64: 128, 128>}, {pipeline_mode = #tpu.pipeline_mode<synchronous>, transform_indices = @transform_4, window_bounds = array<i64: 1, 128>}, {transform_indices = @transform_5, window_bounds = array<i64: 8, 128>}]} {
    %c0 = arith.constant 0 : index
    %c0_0 = arith.constant 0 : index
    %0 = vector.load %arg1[%c0, %c0_0] : memref<8x128xf32, #tpu.memory_space<vmem>>, vector<8x128xf32>
    %c0_1 = arith.constant 0 : index
    %c0_2 = arith.constant 0 : index
    %1 = vector.load %arg2[%c0_1, %c0_2] : memref<128x128xf32, #tpu.memory_space<vmem>>, vector<128x128xf32>
    %cst = arith.constant dense<0.000000e+00> : vector<8x128xf32>
    %2 = tpu.matmul %0, %1, %cst {dimension_numbers = #tpu.dot_dimension_numbers<[1], [0], [0], [1], [0, 0, 1, 1], [], []>} : vector<8x128xf32>, vector<128x128xf32>, vector<8x128xf32> -> vector<8x128xf32>
    %c0_3 = arith.constant 0 : index
    %c0_4 = arith.constant 0 : index
    %3 = vector.load %arg3[%c0_3, %c0_4] : memref<1x128xf32, #tpu.memory_space<vmem>>, vector<1x128xf32>
    %4 = vector.broadcast %3 : vector<1x128xf32> to vector<8x128xf32>
    %5 = arith.addf %2, %4 : vector<8x128xf32>
    %cst_5 = arith.constant 0.000000e+00 : f32
    %6 = vector.broadcast %cst_5 : f32 to vector<8x128xf32>
    %7 = arith.maximumf %5, %6 : vector<8x128xf32>
    %c0_6 = arith.constant 0 : index
    %c0_7 = arith.constant 0 : index
    %8 = vector.load %arg4[%c0_6, %c0_7] : memref<128x128xf32, #tpu.memory_space<vmem>>, vector<128x128xf32>
    %cst_8 = arith.constant dense<0.000000e+00> : vector<8x128xf32>
    %9 = tpu.matmul %7, %8, %cst_8 {dimension_numbers = #tpu.dot_dimension_numbers<[1], [0], [0], [1], [0, 0, 1, 1], [], []>} : vector<8x128xf32>, vector<128x128xf32>, vector<8x128xf32> -> vector<8x128xf32>
    %c0_9 = arith.constant 0 : index
    %c0_10 = arith.constant 0 : index
    %10 = vector.load %arg5[%c0_9, %c0_10] : memref<1x128xf32, #tpu.memory_space<vmem>>, vector<1x128xf32>
    %11 = vector.broadcast %10 : vector<1x128xf32> to vector<8x128xf32>
    %12 = arith.addf %9, %11 : vector<8x128xf32>
    %c0_11 = arith.constant 0 : index
    %c0_12 = arith.constant 0 : index
    %13 = vector.load %arg6[%c0_11, %c0_12] : memref<8x128xf32, #tpu.memory_space<vmem>>, vector<8x128xf32>
    tpu.vector_store %arg6[%c0_11, %c0_12], %12 {strides = array<i32>} : memref<8x128xf32, #tpu.memory_space<vmem>>, vector<8x128xf32>,
    return
  }
  func.func @transform_0(%arg0: i32) -> (i32, i32) {
    %c0_i32 = arith.constant 0 : i32
    %c0_i32_0 = arith.constant 0 : i32
    return %arg0, %c0_i32 : i32, i32
  }
  func.func @transform_1(%arg0: i32) -> (i32, i32) {
    %c0_i32 = arith.constant 0 : i32
    %c0_i32_0 = arith.constant 0 : i32
    %c0_i32_1 = arith.constant 0 : i32
    return %c0_i32, %c0_i32_0 : i32, i32
  }
  func.func @transform_2(%arg0: i32) -> (i32, i32) {
    %c0_i32 = arith.constant 0 : i32
    %c0_i32_0 = arith.constant 0 : i32
    %c0_i32_1 = arith.constant 0 : i32
    return %c0_i32, %c0_i32_0 : i32, i32
  }
  func.func @transform_3(%arg0: i32) -> (i32, i32) {
    %c0_i32 = arith.constant 0 : i32
    %c0_i32_0 = arith.constant 0 : i32
    %c0_i32_1 = arith.constant 0 : i32
    return %c0_i32, %c0_i32_0 : i32, i32
  }
  func.func @transform_4(%arg0: i32) -> (i32, i32) {
    %c0_i32 = arith.constant 0 : i32
    %c0_i32_0 = arith.constant 0 : i32
    %c0_i32_1 = arith.constant 0 : i32
    return %c0_i32, %c0_i32_0 : i32, i32
  }
  func.func @transform_5(%arg0: i32) -> (i32, i32) {
    %c0_i32 = arith.constant 0 : i32
    %c0_i32_0 = arith.constant 0 : i32
    return %arg0, %c0_i32 : i32, i32
  }
}

</mosaic_0001>

<bundles_post_ra>
// kernel: tpu_custom_call.1
= control target key start
LH: loop header
LB: loop body
LE: loop exit
PB: predicated region body
PF: predicated region fallthrough
CT: control target
= control target key end

     0   :  { %10 = vsyncpa [#allocation3], 0  ;;  %s1434_s0 = inlined_call_operand.hbm [shape: f32[16,128], index: 0, kind: input, shape index: {}]   ;;  %s1435_s1 = inlined_call_operand.hbm [shape: f32[128,128], index: 1, kind: input, shape index: {}]   ;;  %s1436_s2 = inlined_call_operand.hbm [shape: f32[1,128], index: 2, kind: input, shape index: {}]   ;;  %s1437_s3 = inlined_call_operand.hbm [shape: f32[128,128], index: 3, kind: input, shape index: {}]   ;;  %s1438_s4 = inlined_call_operand.hbm [shape: f32[1,128], index: 4, kind: input, shape index: {}]   ;;  %s1439_s5 = inlined_call_operand.hbm [shape: f32[16,128], index: 5, kind: output, shape index: {}]  }
   0x1   :  { %12 = vsyncpa [#allocation3 + $0x1], 0 }
   0x2   :  { %13 = vsyncpa [#allocation6], 0 }
   0x3   :  { %14 = vsyncpa [#allocation9], 0 }
   0x4   :  { %15 = vsyncpa [#allocation4], 0 }
   0x5   :  { %17 = vsyncpa [#allocation4 + $0x1], 0  ;;  %s1130_s18 = smov 0   ;;  %s1132_s19 = smov 0  }
   0x6   :  { %s1134_s20 = smov 0   ;;  %s1136_s21 = smov 0  }
   0x7 LB: > { %s1089_s22 = smov [#allocation5]   ;;  %s1151_s24 = sadd.s32 4294967295, %s1087_s21   ;;  %s1087_s21 = sphi %s1136_s21, %s1463_s21   ;;  %s1083_s20 = sphi %s1134_s20, %s1462_s20   ;;  %s1079_s19 = sphi %s1132_s19, %s1461_s19   ;;  %s1075_s18 = sphi %s1130_s18, %s1460_s18  }
   0x8   : > { %s176_s23 = sshll.u32 %s1089_s22, 4  ;;  %p606_p0 = scmp.ge.s32.totalorder %s1087_s21, 1  ;;  %s1156_s23 = int_to_ptr.vmem [resolvable:$true] %s176_s23 }
   0x9   : > { %p1440_p1 = scmp.eq.s32.totalorder %s1151_s24, 0  ;;  %p164_p2 = scmp.lt.s32.totalorder %s1087_s21, 3 }
   0xa   : > { %s1090_s26 = smov [#allocation8]   ;;  %s1091_s29 = smov [#allocation7]  }
   0xb   : > { %p1158_p3 = pnand %p606_p0, %p164_p2  ;;  %s200_s27 = sshll.u32 %s1090_s26, 4  ;;  %s1171_s27 = int_to_ptr.vmem [resolvable:$true] %s200_s27 }
   0xc   : > { %s190_s30 = sshll.u32 %s1091_s29, 4  ;;  %s871_s8 = scalar_lea.hbm %s1435_s1, 2048  ;;  %s1173_s30 = int_to_ptr.vmem [resolvable:$true] %s190_s30 }
   0xd   : > { %s1443_s25 = scalar_select %p1158_p3, 1, 0 }
   0xe   : > { %p799_p5 = pneg %p1158_p3  ;;  %p872_p7 = scmp.ne.s32.totalorder %s1435_s1, %s871_s8 }
   0xf   : > { %p878_p11 = scmp.lt.u32.totalorder %s871_s8, %s1435_s1 }
  0x10   : > { %p1167_p6 = pnand %p799_p5, %p1440_p1 }
  0x12   : > { %p1183_p8 = pneg %p1167_p6 }
  0x14   : > { %p874_p9 = pnand %p1183_p8, %p872_p7 }
  0x16   : > { %p875_p10 = pneg %p874_p9 }
  0x18   : > { %p880_p12 = pnand %p878_p11, %p875_p10 }
  0x1a   : > { %883 = shalt.err (!%p880_p12)
}
  0x1b   : > { %s884_s14 = scalar_lea.vmem %s1156_s23, 2048  ;;  %p892_p5 = scmp.lt.s32.totalorder %s1156_s23, %s1156_s23 }
  0x1c   : > { %p885_p13 = scmp.ne.s32.totalorder %s1156_s23, %s884_s14  ;;  %p893_p4 = scmp.lt.s32.totalorder %s884_s14, %s884_s14 }
  0x1e   : > { %p887_p0 = pnand %p885_p13, %p1183_p8  ;;  %p894_p7 = por %p893_p4, %p892_p5 }
  0x20   : > { %p888_p2 = pneg %p887_p0 }
  0x22   : > { %p895_p9 = pnand %p894_p7, %p888_p2 }
  0x24   : > { %898 = shalt.err (!%p895_p9)
}
  0x25   : > { %s1092_s15 = smov 128   ;;  %s1093_s16 = smov 8  }
  0x26   : > { %802 = dma.hbm_to_vmem [thread:$0]  (!%p1167_p6), %s1435_s1, 2048, %s1156_s23, [#allocation6], %s1092_s15, %s1092_s15, %s1093_s16  }
  0x27   : > { %s899_s6 = scalar_lea.hbm %s1437_s3, 2048 }
  0x28   : > { %p900_p4 = scmp.ne.s32.totalorder %s1437_s3, %s899_s6  ;;  %p906_p12 = scmp.lt.u32.totalorder %s899_s6, %s1437_s3 }
  0x2a   : > { %p902_p10 = pnand %p900_p4, %p1183_p8 }
  0x2c   : > { %p903_p11 = pneg %p902_p10 }
  0x2e   : > { %p908_p13 = pnand %p906_p12, %p903_p11 }
  0x30   : > { %911 = shalt.err (!%p908_p13)
}
  0x31   : > { %s912_s23 = scalar_lea.vmem %s1171_s27, 2048  ;;  %p920_p7 = scmp.lt.s32.totalorder %s1171_s27, %s1171_s27 }
  0x32   : > { %p913_p0 = scmp.ne.s32.totalorder %s1171_s27, %s912_s23  ;;  %p921_p9 = scmp.lt.s32.totalorder %s912_s23, %s912_s23 }
  0x34   : > { %p915_p2 = pnand %p913_p0, %p1183_p8  ;;  %p922_p4 = por %p921_p9, %p920_p7 }
  0x36   : > { %p916_p5 = pneg %p915_p2 }
  0x38   : > { %p923_p10 = pnand %p922_p4, %p916_p5 }
  0x3a   : > { %926 = shalt.err (!%p923_p10)
}
  0x3b   : > { %808 = dma.hbm_to_vmem [thread:$0]  (!%p1167_p6), %s1437_s3, 2048, %s1171_s27, [#allocation9], %s1092_s15, %s1092_s15, %s1093_s16  }
  0x3c   : > { %s927_s22 = scalar_lea.hbm %s1436_s2, 16 }
  0x3d   : > { %p928_p11 = scmp.ne.s32.totalorder %s1436_s2, %s927_s22  ;;  %p934_p0 = scmp.lt.u32.totalorder %s927_s22, %s1436_s2 }
  0x3f   : > { %p930_p12 = pnand %p928_p11, %p1183_p8 }
  0x41   : > { %p931_p13 = pneg %p930_p12 }
  0x43   : > { %p936_p2 = pnand %p934_p0, %p931_p13 }
  0x45   : > { %939 = shalt.err (!%p936_p2)
}
  0x46   : > { %s940_s27 = scalar_lea.vmem %s1173_s30, 16  ;;  %s947_s15 = scalar_lea.vmem %s1173_s30, 32 }
  0x47   : > { %p941_p5 = scmp.ne.s32.totalorder %s1173_s30, %s940_s27  ;;  %p948_p4 = scmp.lt.s32.totalorder %s1173_s30, %s1173_s30 }
  0x48   : > { %p949_p10 = scmp.lt.s32.totalorder %s947_s15, %s940_s27 }
  0x49   : > { %p943_p7 = pnand %p941_p5, %p1183_p8 }
  0x4a   : > { %p950_p11 = por %p949_p10, %p948_p4 }
  0x4b   : > { %p944_p9 = pneg %p943_p7 }
  0x4d   : > { %p951_p12 = pnand %p950_p11, %p944_p9 }
  0x4f   : > { %954 = shalt.err (!%p951_p12)
}
  0x50   : > { %805 = dma.hbm_to_vmem [thread:$0]  (!%p1167_p6), %s1436_s2, 16, %s1173_s30, [#allocation6]  }
  0x51   : > { %s1094_s9 = smov [#allocation10]   ;;  %s955_s13 = scalar_lea.hbm %s1438_s4, 16 }
  0x52   : > { %s214_s10 = sshll.u32 %s1094_s9, 4  ;;  %p956_p13 = scmp.ne.s32.totalorder %s1438_s4, %s955_s13  ;;  %s215_s10 = int_to_ptr.vmem [resolvable:$true] %s214_s10 }
  0x53   : > { %p962_p5 = scmp.lt.u32.totalorder %s955_s13, %s1438_s4 }
  0x54   : > { %p958_p0 = pnand %p956_p13, %p1183_p8 }
  0x56   : > { %p959_p2 = pneg %p958_p0 }
  0x58   : > { %p964_p7 = pnand %p962_p5, %p959_p2 }
  0x5a   : > { %967 = shalt.err (!%p964_p7)
}
  0x5b   : > { %s968_s30 = scalar_lea.vmem %s215_s10, 16  ;;  %s975_s29 = scalar_lea.vmem %s215_s10, 32 }
  0x5c   : > { %p969_p9 = scmp.ne.s32.totalorder %s215_s10, %s968_s30  ;;  %p976_p11 = scmp.lt.s32.totalorder %s215_s10, %s215_s10 }
  0x5d   : > { %p977_p12 = scmp.lt.s32.totalorder %s975_s29, %s968_s30 }
  0x5e   : > { %p971_p4 = pnand %p969_p9, %p1183_p8 }
  0x5f   : > { %p978_p1 = por %p977_p12, %p976_p11 }
  0x60   : > { %p972_p10 = pneg %p971_p4 }
  0x62   : > { %p979_p3 = pnand %p978_p1, %p972_p10 }
  0x64   : > { %982 = shalt.err (!%p979_p3)
}
  0x65   : > { %811 = dma.hbm_to_vmem [thread:$0]  (!%p1167_p6), %s1438_s4, 16, %s215_s10, [#allocation9]  }
  0x66   : > { %s605_s11 = sadd.s32 4294967294, %s1087_s21   ;;  %s1271_s28 = sadd.s32 1, %s1087_s21  }
  0x67   : > { %s27_s27 = ssub.s32 %s1087_s21, %s1271_s28  ;;  %s30_s15 = sadd.s32 1, %s1083_s20 }
  0x68   : > { %p28_p1 = scmp.eq.s32.totalorder %s27_s27, 0  ;;  %p37_p3 = scmp.ne.s32.totalorder %s1083_s20, %s1079_s19 }
  0x69   : > { %p38_p8 = scmp.eq.s32.totalorder %s1087_s21, 0  ;;  %p43_p13 = scmp.ne.s32.totalorder %s1079_s19, %s1075_s18 }
  0x6a   : > { %s1282_s16 = scalar_select %p28_p1, %s1083_s20, %s30_s15  }
  0x6b   : > { %p1284_p0 = por %p38_p8, %p37_p3  ;;  %p1447_p2 = scmp.eq.s32.totalorder %s1151_s24, 0 }
  0x6c   : > { %p151_p5 = scmp.eq.s32.totalorder %s1151_s24, 1  ;;  %p157_p7 = scmp.eq.s32.totalorder %s605_s11, 1 }
  0x6d   : > { %p1290_p6 = por %p1447_p2, %p43_p13  ;;  %p824_p9 = scmp.lt.s32.totalorder %s1087_s21, 2 }
  0x6e   : > { %s225_s10 = sand.u32 1, %s1083_s20   ;;  %p1297_p4 = por %p151_p5, %p37_p3 }
  0x6f   : > { %p1301_p10 = por %p157_p7, %p43_p13  ;;  %s612_s13 = sshll.u32 %s225_s10, 3 }
  0x70   : > { %s1449_s23 = scalar_select %p1297_p4, 1, 0 }
  0x71   : > { %s1450_s12 = scalar_select %p1301_p10, 1, 0 }
  0x72   : > { %s613_s14 = sshll.u32 %s1087_s21, 7  ;;  %s229_s30 = scalar_lea.vmem [#allocation2], %s612_s13 }
  0x73   : > { %s1309_s26 = scalar_lea.hbm %s1434_s0, %s613_s14  ;;  %s236_s29 = sshll.u32 %s229_s30, 4  ;;  %s1311_s29 = int_to_ptr.vmem [resolvable:$true] %s236_s29 }
  0x74   : > { %p1315_p11 = pnand %p824_p9, %p1284_p0  ;;  %s226_s7 = scalar_lea.sflag [#allocation3], %s225_s10 }
  0x75   : > { %s983_s11 = scalar_lea.hbm %s1309_s26, 128  ;;  %s988_s13 = scalar_lea.hbm %s1434_s0, 256 }
  0x76   : > { %p984_p12 = scmp.ne.s32.totalorder %s1309_s26, %s983_s11  ;;  %p985_p1 = pneg %p1315_p11 }
  0x77   : > { %p989_p13 = scmp.lt.u32.totalorder %s1309_s26, %s1434_s0  ;;  %p990_p0 = scmp.lt.u32.totalorder %s988_s13, %s983_s11 }
  0x78   : > { %p986_p3 = pnand %p985_p1, %p984_p12  ;;  %p992_p5 = scmp.lt.u32.totalorder %s983_s11, %s1309_s26 }
  0x79   : > { %p991_p2 = por %p990_p0, %p989_p13 }
  0x7a   : > { %p987_p8 = pneg %p986_p3 }
  0x7b   : > { %p993_p7 = por %p992_p5, %p991_p2 }
  0x7d   : > { %p994_p9 = pnand %p993_p7, %p987_p8 }
  0x7f   : > { %997 = shalt.err (!%p994_p9)
}
  0x80   : > { %s998_s10 = scalar_lea.vmem %s1311_s29, 128  ;;  %s1095_s17 = smov [#allocation2]  }
  0x81   : > { %p999_p12 = scmp.ne.s32.totalorder %s1311_s29, %s998_s10  ;;  %s1003_s22 = sshll.u32 %s1095_s17, 4  ;;  %s1004_s22 = int_to_ptr.vmem [resolvable:$false] %s1003_s22 }
  0x82   : > { %s1005_s30 = scalar_lea.vmem %s1004_s22, 256  ;;  %p1006_p4 = scmp.lt.s32.totalorder %s1311_s29, %s1004_s22 }
  0x83   : > { %p1001_p3 = pnand %p999_p12, %p985_p1  ;;  %p1007_p13 = scmp.lt.s32.totalorder %s1005_s30, %s998_s10 }
  0x85   : > { %p1002_p10 = pneg %p1001_p3  ;;  %p1008_p0 = por %p1007_p13, %p1006_p4 }
  0x87   : > { %p1009_p2 = pnand %p1008_p0, %p1002_p10 }
  0x89   : > { %1012 = shalt.err (!%p1009_p2)
}
  0x8a   : > { %815 = dma.hbm_to_vmem [thread:$0]  (!%p1315_p11), %s1309_s26, 128, %s1311_s29, %s226_s7  }
  0x8b   : > { %p1452_p8 = scmp.ne.s32.totalorder %s1443_s25, 0 }
  0x8c   : > { %s1347_s11 = sand.u32 (!%p1452_p8), 1, %s1079_s19  }
  0x8d   : > { %245 = sbr.rel (%p1452_p8) target bundleno = 633 (0x279), region = 40  ;;  %s615_s27 = sshll.u32 (!%p1452_p8), %s1347_s11, 3 }
  0x8e   : > { %s248_s15 = scalar_lea.sflag (!%p1452_p8), [#allocation3], %s1347_s11  ;;  %s1353_s13 = scalar_lea.vmem (!%p1452_p8), [#allocation2], %s615_s27 }
  0x94   : > { %1058 = dma.done.wait (%p1290_p6), %s248_s15, 128  }
  0x95   : > { %1060 = vsyncadd (%p1290_p6), %s248_s15, 4294967168  ;;  %p1453_p4 = scmp.eq.s32.totalorder %s1151_s24, 0 }
  0x97   : > { %1062 = dma.done.wait (%p1453_p4), [#allocation6], 2064   ;;  %p1454_p10 = pmov %p1453_p4 }
  0x98   : > { %p1455_p11 = pmov %p1453_p4 }
  0x99   : > { %1064 = vsyncadd (%p1454_p10), [#allocation6], 4294965232 }
  0x9a   : > { %1066 = dma.done.wait (%p1455_p11), [#allocation9], 2064   ;;  %p1456_p1 = pmov %p1453_p4 }
  0x9b   : > { %v1096_v0 = vmov 0.0|0.0   ;;  %vm1097_vm0 = vmmov 0   ;;  %v1098_v1 = vmov 0.0   ;;  %v295_v2 = vld [vmem:[#allocation5] sm:$0xff]  ;;  %v296_v3 = vld [vmem:[#allocation5 + $0x8] sm:$0xff]  ;;  %v297_v4 = vld [vmem:[#allocation5 + $0x10] sm:$0xff] }
  0x9c   : > { %1068 = vsyncadd (%p1456_p1), [#allocation9], 4294965232  ;;  %731 = vmatprep.subr.bf16.mxu0 %v1096_v0  ;;  %693 = vmatprep.mubr.msk.f32.mxu0 %vm1097_vm0, %v1098_v1  ;;  %v732_v5 = vpack.c.bf16 %v296_v3, %v295_v2  ;;  %v298_v6 = vld [vmem:[#allocation5 + $0x18] sm:$0xff]  ;;  %v299_v8 = vld [vmem:[#allocation5 + $0x20] sm:$0xff]  ;;  %s624_s25 = sshll.u32 %s1151_s24, 7  ;;  %s293_s9 = scalar_lea.vmem [#allocation11], %s615_s27 }
  0x9d   : > { %755 = vmatprep.subr.bf16.mxu1 %v1096_v0  ;;  %728 = vmatprep.mubr.msk.f32.mxu1 %vm1097_vm0, %v1098_v1  ;;  %v735_v7 = vpack.c.bf16 %v298_v6, %v297_v4  ;;  %v300_v9 = vld [vmem:[#allocation5 + $0x28] sm:$0xff]  ;;  %v391_v12 = vld [vmem:[#allocation8 + $0x10] sm:$0xff]  ;;  %v392_v13 = vld [vmem:[#allocation8 + $0x18] sm:$0xff]  ;;  %s497_s26 = sshll.u32 %s293_s9, 4  ;;  %s1390_s7 = scalar_lea.hbm %s1439_s5, %s624_s25  ;;  %s1392_s26 = int_to_ptr.vmem [resolvable:$true] %s497_s26 }
  0x9e   : > { %733 = vmatpush3.bf16.msra.mxu0 %v732_v5  ;;  %v389_v10 = vld [vmem:[#allocation8] sm:$0xff]  ;;  %v390_v11 = vld [vmem:[#allocation8 + $0x8] sm:$0xff]  ;;  %v738_v14 = vpack.c.bf16 %v300_v9, %v299_v8  ;;  %v302_v17 = vld [vmem:[#allocation5 + $0x38] sm:$0xff]  ;;  %v759_v18 = vpack.c.bf16 %v392_v13, %v391_v12  ;;  %s484_s8 = scalar_lea.sflag [#allocation4], %s1347_s11  ;;  %s1013_s14 = scalar_lea.vmem %s1392_s26, 128 }
  0x9f   : > { %734 = vmatprep.subr.bf16.mxu0 %v1096_v0  ;;  %v756_v15 = vpack.c.bf16 %v390_v11, %v389_v10  ;;  %v301_v16 = vld [vmem:[#allocation5 + $0x30] sm:$0xff]  ;;  %v393_v19 = vld [vmem:[#allocation8 + $0x20] sm:$0xff]  ;;  %v396_v26 = vld [vmem:[#allocation8 + $0x38] sm:$0xff]  ;;  %p1014_p6 = scmp.ne.s32.totalorder %s1392_s26, %s1013_s14  ;;  %p1457_p5 = scmp.ne.s32.totalorder %s1449_s23, 0 }
  0xa0   : > { %v394_v20 = vld [vmem:[#allocation8 + $0x28] sm:$0xff]  ;;  %v741_v21 = vpack.c.bf16 %v302_v17, %v301_v16  ;;  %v303_v22 = vld [vmem:[#allocation5 + $0x40] sm:$0xff]  ;;  %v395_v25 = vld [vmem:[#allocation8 + $0x30] sm:$0xff]  ;;  %s1099_s24 = smov [#allocation11]  }
  0xa1   : > { %757 = vmatpush3.bf16.msra.mxu1 %v756_v15  ;;  %v304_v23 = vld [vmem:[#allocation5 + $0x48] sm:$0xff]  ;;  %v762_v24 = vpack.c.bf16 %v394_v20, %v393_v19  ;;  %v305_v28 = vld [vmem:[#allocation5 + $0x50] sm:$0xff]  ;;  %v306_v29 = vld [vmem:[#allocation5 + $0x58] sm:$0xff]  ;;  %v765_v30 = vpack.c.bf16 %v396_v26, %v395_v25  ;;  %p1015_p7 = pnand %p1014_p6, %p1457_p5  ;;  %s1017_s10 = sshll.u32 %s1099_s24, 4  ;;  %s1018_s10 = int_to_ptr.vmem [resolvable:$false] %s1017_s10 }
  0xa2   : > { %736 = vmatpush3.bf16.msra.mxu0 %v735_v7  ;;  %758 = vmatprep.subr.bf16.mxu1 %v1096_v0  ;;  %v744_v27 = vpack.c.bf16 %v304_v23, %v303_v22  ;;  %v397_v31 = vld [vmem:[#allocation8 + $0x40] sm:$0xff]  ;;  %v398_v32 = vld [vmem:[#allocation8 + $0x48] sm:$0xff]  ;;  %v747_v33 = vpack.c.bf16 %v306_v29, %v305_v28  ;;  %v399_v37 = vld [vmem:[#allocation8 + $0x50] sm:$0xff]  ;;  %s1019_s17 = scalar_lea.vmem %s1018_s10, 256  ;;  %p1020_p12 = scmp.lt.s32.totalorder %s1392_s26, %s1018_s10 }
  0xa3   : > { %737 = vmatprep.subr.bf16.mxu0 %v1096_v0  ;;  %v307_v34 = vld [vmem:[#allocation5 + $0x60] sm:$0xff]  ;;  %v308_v35 = vld [vmem:[#allocation5 + $0x68] sm:$0xff]  ;;  %v768_v36 = vpack.c.bf16 %v398_v32, %v397_v31  ;;  %v309_v40 = vld [vmem:[#allocation5 + $0x70] sm:$0xff]  ;;  %p1016_p9 = pneg %p1015_p7  ;;  %p1021_p3 = scmp.lt.s32.totalorder %s1019_s17, %s1013_s14 }
  0xa4   : > { %v400_v38 = vld [vmem:[#allocation8 + $0x58] sm:$0xff]  ;;  %v750_v39 = vpack.c.bf16 %v308_v35, %v307_v34  ;;  %v401_v43 = vld [vmem:[#allocation8 + $0x60] sm:$0xff]  ;;  %v402_v44 = vld [vmem:[#allocation8 + $0x68] sm:$0xff] }
  0xa5   : > { %760 = vmatpush3.bf16.msra.mxu1 %v759_v18  ;;  %v310_v41 = vld [vmem:[#allocation5 + $0x78] sm:$0xff]  ;;  %v771_v42 = vpack.c.bf16 %v400_v38, %v399_v37  ;;  %v774_v46 = vpack.c.bf16 %v402_v44, %v401_v43  ;;  %v621_v51 = vld [vmem:[#allocation7] ss:$0 sm:$0xff]  ;;  %v622_v56 = vld [vmem:[#allocation10] ss:$0 sm:$0xff]  ;;  %p1022_p13 = por %p1021_p3, %p1020_p12 }
  0xa6   : > { %739 = vmatpush3.bf16.msra.mxu0 %v738_v14  ;;  %761 = vmatprep.subr.bf16.mxu1 %v1096_v0  ;;  %v753_v45 = vpack.c.bf16 %v310_v41, %v309_v40  ;;  %v294_v47 = vld [vmem:[%s1353_s13] sm:$0xff] }
  0xa7   : > { %740 = vmatprep.subr.bf16.mxu0 %v1096_v0  ;;  %v403_v48 = vld [vmem:[#allocation8 + $0x70] sm:$0xff]  ;;  %v404_v49 = vld [vmem:[#allocation8 + $0x78] sm:$0xff]  ;;  %p1023_p0 = pnand %p1022_p13, %p1016_p9 }
  0xa8   : > { %v777_v50 = vpack.c.bf16 %v404_v49, %v403_v48 }
  0xa9   : > { %763 = vmatpush3.bf16.msra.mxu1 %v762_v24 }
  0xaa   : > { %742 = vmatpush3.bf16.msra.mxu0 %v741_v21  ;;  %764 = vmatprep.subr.bf16.mxu1 %v1096_v0 }
  0xab   : > { %743 = vmatprep.subr.bf16.mxu0 %v1096_v0 }
  0xad   : > { %766 = vmatpush3.bf16.msra.mxu1 %v765_v30 }
  0xae   : > { %745 = vmatpush3.bf16.msra.mxu0 %v744_v27  ;;  %767 = vmatprep.subr.bf16.mxu1 %v1096_v0 }
  0xaf   : > { %746 = vmatprep.subr.bf16.mxu0 %v1096_v0 }
  0xb1   : > { %769 = vmatpush3.bf16.msra.mxu1 %v768_v36 }
  0xb2   : > { %748 = vmatpush3.bf16.msra.mxu0 %v747_v33  ;;  %770 = vmatprep.subr.bf16.mxu1 %v1096_v0 }
  0xb3   : > { %749 = vmatprep.subr.bf16.mxu0 %v1096_v0 }
  0xb5   : > { %772 = vmatpush3.bf16.msra.mxu1 %v771_v42 }
  0xb6   : > { %751 = vmatpush3.bf16.msra.mxu0 %v750_v39  ;;  %773 = vmatprep.subr.bf16.mxu1 %v1096_v0 }
  0xb7   : > { %752 = vmatprep.subr.bf16.mxu0 %v1096_v0 }
  0xb9   : > { %775 = vmatpush3.bf16.msra.mxu1 %v774_v46 }
  0xba   : > { %754 = vmatpush3.bf16.msra.mxu0 %v753_v45  ;;  %776 = vmatprep.subr.bf16.mxu1 %v1096_v0 }
  0xbd   : > { %694 = vmatmul.mubr.f32.vlgmr.msra.gmra.mrb[0].mxu0 %v294_v47  ;;  %778 = vmatpush3.bf16.msra.mxu1 %v777_v50 }
 0x190   : > { %v384_v52 = vpop.f32.mrb[0].mxu0 }
 0x191   : > { %v385_v53 = vadd.f32 %v621_v51, %v384_v52  ;;  %v695_v54 = vpop.f32.mrb[1].mxu0 }
 0x193   : > { %v388_v55 = vmax.f32 %v385_v53, 0.0 }
 0x195   : > { %729 = vmatmul.mubr.f32.vlgmr.msra.gmra.mrb[0].mxu1 %v388_v55 }
 0x268   : > { %v478_v57 = vpop.f32.mrb[0].mxu1 }
 0x269   : > { %v479_v58 = vadd.f32 %v622_v56, %v478_v57  ;;  %v730_v59 = vpop.f32.mrb[1].mxu1 }
 0x26b   : > { %482 = vst [vmem:[%s293_s9] sm:$0xff] %v479_v58 }
 0x26c   : > { %1026 = shalt.err (!%p1023_p0)
}
 0x26d   : > { %s1027_s22 = scalar_lea.hbm %s1390_s7, 128  ;;  %s1031_s27 = scalar_lea.hbm %s1439_s5, 256 }
 0x26e   : > { %p1028_p2 = scmp.ne.s32.totalorder %s1390_s7, %s1027_s22  ;;  %p1032_p10 = scmp.lt.u32.totalorder %s1390_s7, %s1439_s5 }
 0x26f   : > { %p1033_p11 = scmp.lt.u32.totalorder %s1031_s27, %s1027_s22  ;;  %p1035_p6 = scmp.lt.u32.totalorder %s1027_s22, %s1390_s7 }
 0x270   : > { %p1029_p8 = pnand %p1028_p2, %p1457_p5 }
 0x271   : > { %p1034_p1 = por %p1033_p11, %p1032_p10 }
 0x272   : > { %p1030_p4 = pneg %p1029_p8 }
 0x273   : > { %p1036_p7 = por %p1035_p6, %p1034_p1 }
 0x275   : > { %p1037_p9 = pnand %p1036_p7, %p1030_p4 }
 0x277   : > { %1040 = shalt.err (!%p1037_p9)
}
 0x278   : > { %797 = dma.vmem_to_hbm [thread:$0]  (%p1457_p5), %s1392_s26, 128, %s1390_s7, %s484_s8  }
 0x279 PF: > { %s509_s25 = sand.u32 1, %s1075_s18   ;;  %p1458_p12 = scmp.ne.s32.totalorder %s1450_s12, 0 }
 0x27a   : > { %p1459_p3 = scmp.ge.s32.totalorder %s1087_s21, 2  ;;  %s510_s9 = scalar_lea.sflag [#allocation4], %s509_s25 }
 0x27c   : > { %p817_p13 = pnand %p1459_p3, %p1458_p12 }
 0x27e   : > { %1070 = dma.done.wait (!%p817_p13), %s510_s9, 128  }
 0x27f   : > { %1072 = vsyncadd (!%p817_p13), %s510_s9, 4294967168  ;;  %p20_p0 = scmp.ge.s32.totalorder %s1271_s28, 4   ;;  %s1460_s18 = smov %s1079_s19 }
 0x280   : > { %s1461_s19 = smov %s1083_s20  ;;  %s1462_s20 = smov %s1282_s16 }
 0x281   : > { %s1463_s21 = smov %s1271_s28  ;;  %22 = sbr.rel (!%p20_p0) target bundleno = 7 (0x7), region = 101 }
 0x288   :  { %515 = vsyncpa [#allocation3], 1 }
 0x289   :  { %517 = vsyncpa [#allocation3 + $0x1], 1 }
 0x28a   :  { %518 = vsyncpa [#allocation6], 1 }
 0x28b   :  { %519 = vsyncpa [#allocation9], 1 }
 0x28c   :  { %520 = vsyncpa [#allocation4], 1 }
 0x28d   :  { %522 = vsyncpa [#allocation4 + $0x1], 1 }

</bundles_post_ra>
